<compile_context>
chip_gen: v5e
topology: v5e:2x2
jax: 0.10.0
libtpu: 0.0.40
codegen_flags: <defaults>
</compile_context>

<pallas_src>
import jax
import jax.numpy as jnp
from jax.experimental import pallas as pl
from jax.experimental.pallas import tpu as pltpu


def cnf_reg_kernel(x_ref, w1_ref, b1_ref, w2t_ref, b2_ref, s_ref,
                   dx_ref, neg_trj_ref):
    x = x_ref[...]            # (TB, D) bf16
    w1 = w1_ref[...]          # (H, D)  bf16
    w2t = w2t_ref[...]        # (H, D)  bf16  (this is W2.T)

    # hidden pre-activation: x @ W1^T + b1 -> (TB, H)
    # bf16 MXU operands, f32 accumulation; bias / tanh stay in f32.
    pre = jax.lax.dot_general(
        x, w1, (((1,), (1,)), ((), ())),
        preferred_element_type=jnp.float32) + b1_ref[...]
    h = jnp.tanh(pre)                                          # (TB, H) f32 (EUP)

    # velocity dx = h @ W2^T + b2 -> (TB, D)   (MXU, bf16 operands, f32 acc)
    dx = jnp.dot(h.astype(jnp.bfloat16), w2t,
                 preferred_element_type=jnp.float32) + b2_ref[...]
    dx_ref[...] = dx

    # analytic Jacobian trace of dx wrt x (== autograd_trace), all in f32.
    # VPU multiply + XLU last-axis reduce -- keeps the MXU free.
    trj = jnp.sum((1.0 - h * h) * s_ref[...], axis=-1, keepdims=True)  # (TB, 1)
    neg_trj_ref[...] = -trj


def cnf_reg_forward(t, x, w1, b1, w2, b2, *, block_b=128):
    """Mirrors CNFReg.forward(t, x, dx, context): dx is produced by the
    embedded velocity field, context is None, `t` accepted for parity (the
    synthetic field is autonomous).  Returns (regularization, dx)."""
    del t
    B, D = x.shape
    H = w1.shape[0]

    # Batch tiling: TB rows per grid step (weights stay resident); fall back
    # to a single block for small / ragged batches.
    tb = block_b if (B % block_b == 0) else B
    grid = (B // tb,)

    # bf16 MXU operands at the call boundary (f32 accumulation in-kernel).
    x_bf = x.astype(jnp.bfloat16)
    w1_bf = w1.astype(jnp.bfloat16)
    w2t_bf = w2.T.astype(jnp.bfloat16)        # (H, D)
    b1_2d = b1.reshape(1, H).astype(jnp.float32)
    b2_2d = b2.reshape(1, D).astype(jnp.float32)
    # Weight-only trace contraction s[k] = sum_i W1[k,i] * W2^T[k,i], hoisted
    # out of the per-tile body (f32, from the same bf16-rounded weights the
    # MXU sees, so it is the exact Jacobian of the computed velocity field).
    s = jnp.sum(w1_bf.astype(jnp.float32) * w2t_bf.astype(jnp.float32),
                axis=1).reshape(1, H)

    const = lambda shape: pl.BlockSpec(shape, lambda i: (0, 0))
    dx, neg_trj = pl.pallas_call(
        cnf_reg_kernel,
        out_shape=(jax.ShapeDtypeStruct((B, D), jnp.float32),   # dx
                   jax.ShapeDtypeStruct((B, 1), jnp.float32)),  # -trJ per batch
        grid=grid,
        in_specs=[pl.BlockSpec((tb, D), lambda i: (i, 0)),  # x   (batch-tiled)
                  const((H, D)),                            # W1  (resident)
                  const((1, H)),                            # b1
                  const((H, D)),                            # W2^T
                  const((1, D)),                            # b2
                  const((1, H))],                           # s
        out_specs=(pl.BlockSpec((tb, D), lambda i: (i, 0)),
                   pl.BlockSpec((tb, 1), lambda i: (i, 0))),
        compiler_params=pltpu.CompilerParams(
            dimension_semantics=("parallel",)),
    )(x_bf, w1_bf, b1_2d, w2t_bf, b2_2d, s)

    # Module output: -trJ broadcast over the feature axis ("-trace + 0*x").
    reg = jnp.broadcast_to(neg_trj, (B, D))
    return reg, dx


if __name__ == "__main__":
    # Lane-aligned sizes (D, H multiples of 128) and B = 2 batch tiles so the
    # pipelined / parallel grid path is actually exercised; still tiny overall.
    B, D, H = 256, 128, 128
    key = jax.random.PRNGKey(0)
    kx, k1, k2, k3, k4 = jax.random.split(key, 5)

    x = jax.random.normal(kx, (B, D), dtype=jnp.float32)
    t = jnp.float32(0.5)
    w1 = 0.1 * jax.random.normal(k1, (H, D), dtype=jnp.float32)
    b1 = 0.1 * jax.random.normal(k2, (H,), dtype=jnp.float32)
    w2 = 0.1 * jax.random.normal(k3, (D, H), dtype=jnp.float32)
    b2 = 0.1 * jax.random.normal(k4, (D,), dtype=jnp.float32)

    reg, dx = cnf_reg_forward(t, x, w1, b1, w2, b2)
    jax.block_until_ready((reg, dx))
    assert reg.shape == (B, D) and dx.shape == (B, D)

    # --- Reference 1: pure-JAX mirror at the same precisions (bf16 MXU
    #     operands, f32 accumulation, f32 tanh / trace math). Tight tolerance.
    xb = x.astype(jnp.bfloat16)
    w1b = w1.astype(jnp.bfloat16)
    w2tb = w2.T.astype(jnp.bfloat16)
    pre = jax.lax.dot_general(xb, w1b, (((1,), (1,)), ((), ())),
                              preferred_element_type=jnp.float32) + b1[None, :]
    h = jnp.tanh(pre)
    dx_mirror = jnp.dot(h.astype(jnp.bfloat16), w2tb,
                        preferred_element_type=jnp.float32) + b2[None, :]
    s_mirror = jnp.sum(w1b.astype(jnp.float32) * w2tb.astype(jnp.float32), axis=1)
    trj_mirror = jnp.sum((1.0 - h * h) * s_mirror[None, :], axis=-1)
    reg_mirror = jnp.broadcast_to(-trj_mirror[:, None], (B, D))
    assert jnp.allclose(dx, dx_mirror, atol=1e-3, rtol=1e-3)
    assert jnp.allclose(reg, reg_mirror, atol=1e-3, rtol=1e-3)

    # --- Reference 2: full-f32 autodiff Jacobian trace on a batch subset
    #     (exactly what torch's autograd_trace computes); subset keeps the
    #     check fast, loose tolerance covers the bf16 MXU operands.
    nref = 32

    def velocity_single(xi):
        hh = jnp.tanh(w1 @ xi + b1)
        return w2 @ hh + b2

    x_sub = x[:nref]
    dx_f32 = jax.vmap(velocity_single)(x_sub)
    J = jax.vmap(jax.jacfwd(velocity_single))(x_sub)       # (nref, D, D)
    trj_f32 = jnp.trace(J, axis1=-2, axis2=-1)              # (nref,)
    assert jnp.allclose(dx[:nref], dx_f32, atol=5e-2, rtol=5e-2)
    assert jnp.allclose(reg[:nref, 0], -trj_f32, atol=5e-2, rtol=5e-2)

    # TODO(synk): hutch_trace (stochastic Hutchinson estimator) not implemented;
    # the deterministic autograd_trace path is reproduced exactly (analytically).
    # NOTE: at truly tiny CNF sizes (B~4, D~8) a plain XLA fusion of the same
    # math will match or beat any standalone pallas_call (launch-overhead bound).
    print("KERNEL_OK")
</pallas_src>

<mosaic_0001>
module attributes {stable_mosaic.version = 11 : i64} {
  func.func @cnf_reg_kernel(%arg0: i32, %arg1: memref<128x128xbf16, #tpu.memory_space<vmem>>, %arg2: memref<128x128xbf16, #tpu.memory_space<vmem>>, %arg3: memref<1x128xf32, #tpu.memory_space<vmem>>, %arg4: memref<128x128xbf16, #tpu.memory_space<vmem>>, %arg5: memref<1x128xf32, #tpu.memory_space<vmem>>, %arg6: memref<1x128xf32, #tpu.memory_space<vmem>>, %arg7: memref<128x128xf32, #tpu.memory_space<vmem>>, %arg8: memref<128x1xf32, #tpu.memory_space<vmem>>) attributes {dimension_semantics = [#tpu.dimension_semantics<parallel>], iteration_bounds = array<i64: 2>, scalar_prefetch = 0 : i64, scratch_operands = 0 : i64, tpu.core_type = #tpu.core_type<tc>, window_params = [{transform_indices = @transform_0, window_bounds = array<i64: 128, 128>}, {pipeline_mode = #tpu.pipeline_mode<synchronous>, transform_indices = @transform_1, window_bounds = array<i64: 128, 128>}, {pipeline_mode = #tpu.pipeline_mode<synchronous>, transform_indices = @transform_2, window_bounds = array<i64: 1, 128>}, {pipeline_mode = #tpu.pipeline_mode<synchronous>, transform_indices = @transform_3, window_bounds = array<i64: 128, 128>}, {pipeline_mode = #tpu.pipeline_mode<synchronous>, transform_indices = @transform_4, window_bounds = array<i64: 1, 128>}, {pipeline_mode = #tpu.pipeline_mode<synchronous>, transform_indices = @transform_5, window_bounds = array<i64: 1, 128>}, {transform_indices = @transform_6, window_bounds = array<i64: 128, 128>}, {transform_indices = @transform_7, window_bounds = array<i64: 128, 1>}]} {
    %c0 = arith.constant 0 : index
    %c0_0 = arith.constant 0 : index
    %0 = vector.load %arg1[%c0, %c0_0] : memref<128x128xbf16, #tpu.memory_space<vmem>>, vector<128x128xbf16>
    %c0_1 = arith.constant 0 : index
    %c0_2 = arith.constant 0 : index
    %1 = vector.load %arg2[%c0_1, %c0_2] : memref<128x128xbf16, #tpu.memory_space<vmem>>, vector<128x128xbf16>
    %c0_3 = arith.constant 0 : index
    %c0_4 = arith.constant 0 : index
    %2 = vector.load %arg4[%c0_3, %c0_4] : memref<128x128xbf16, #tpu.memory_space<vmem>>, vector<128x128xbf16>
    %cst = arith.constant dense<0.000000e+00> : vector<128x128xf32>
    %3 = tpu.matmul %0, %1, %cst {dimension_numbers = #tpu.dot_dimension_numbers<[1], [1], [0], [0], [0, 0, 1, 0], [], []>} : vector<128x128xbf16>, vector<128x128xbf16>, vector<128x128xf32> -> vector<128x128xf32>
    %c0_5 = arith.constant 0 : index
    %c0_6 = arith.constant 0 : index
    %4 = vector.load %arg3[%c0_5, %c0_6] : memref<1x128xf32, #tpu.memory_space<vmem>>, vector<1x128xf32>
    %5 = vector.broadcast %4 : vector<1x128xf32> to vector<128x128xf32>
    %6 = arith.addf %3, %5 : vector<128x128xf32>
    %7 = math.tanh %6 : vector<128x128xf32>
    %8 = arith.truncf %7 : vector<128x128xf32> to vector<128x128xbf16>
    %cst_7 = arith.constant dense<0.000000e+00> : vector<128x128xf32>
    %9 = tpu.matmul %8, %2, %cst_7 {dimension_numbers = #tpu.dot_dimension_numbers<[1], [0], [0], [1], [0, 0, 1, 1], [], []>} : vector<128x128xbf16>, vector<128x128xbf16>, vector<128x128xf32> -> vector<128x128xf32>
    %c0_8 = arith.constant 0 : index
    %c0_9 = arith.constant 0 : index
    %10 = vector.load %arg5[%c0_8, %c0_9] : memref<1x128xf32, #tpu.memory_space<vmem>>, vector<1x128xf32>
    %11 = vector.broadcast %10 : vector<1x128xf32> to vector<128x128xf32>
    %12 = arith.addf %9, %11 : vector<128x128xf32>
    %c0_10 = arith.constant 0 : index
    %c0_11 = arith.constant 0 : index
    %13 = vector.load %arg7[%c0_10, %c0_11] : memref<128x128xf32, #tpu.memory_space<vmem>>, vector<128x128xf32>
    tpu.vector_store %arg7[%c0_10, %c0_11], %12 {strides = array<i32>} : memref<128x128xf32, #tpu.memory_space<vmem>>, vector<128x128xf32>,
    %14 = arith.mulf %7, %7 : vector<128x128xf32>
    %cst_12 = arith.constant 1.000000e+00 : f32
    %15 = vector.broadcast %cst_12 : f32 to vector<128x128xf32>
    %16 = arith.subf %15, %14 : vector<128x128xf32>
    %c0_13 = arith.constant 0 : index
    %c0_14 = arith.constant 0 : index
    %17 = vector.load %arg6[%c0_13, %c0_14] : memref<1x128xf32, #tpu.memory_space<vmem>>, vector<1x128xf32>
    %18 = vector.broadcast %17 : vector<1x128xf32> to vector<128x128xf32>
    %19 = arith.mulf %16, %18 : vector<128x128xf32>
    %cst_15 = arith.constant dense<0.000000e+00> : vector<128xf32>
    %20 = vector.multi_reduction <add>, %19, %cst_15 [1] : vector<128x128xf32> to vector<128xf32>
    %21 = vector.shape_cast %20 : vector<128xf32> to vector<128x1xf32>
    %cst_16 = arith.constant 0.000000e+00 : f32
    %22 = vector.broadcast %cst_16 : f32 to vector<128x1xf32>
    %23 = arith.subf %22, %21 : vector<128x1xf32>
    %c0_17 = arith.constant 0 : index
    %c0_18 = arith.constant 0 : index
    %24 = vector.load %arg8[%c0_17, %c0_18] : memref<128x1xf32, #tpu.memory_space<vmem>>, vector<128x1xf32>
    tpu.vector_store %arg8[%c0_17, %c0_18], %23 {strides = array<i32>} : memref<128x1xf32, #tpu.memory_space<vmem>>, vector<128x1xf32>,
    return
  }
  func.func @transform_0(%arg0: i32) -> (i32, i32) {
    %c0_i32 = arith.constant 0 : i32
    %c0_i32_0 = arith.constant 0 : i32
    return %arg0, %c0_i32 : i32, i32
  }
  func.func @transform_1(%arg0: i32) -> (i32, i32) {
    %c0_i32 = arith.constant 0 : i32
    %c0_i32_0 = arith.constant 0 : i32
    %c0_i32_1 = arith.constant 0 : i32
    return %c0_i32, %c0_i32_0 : i32, i32
  }
  func.func @transform_2(%arg0: i32) -> (i32, i32) {
    %c0_i32 = arith.constant 0 : i32
    %c0_i32_0 = arith.constant 0 : i32
    %c0_i32_1 = arith.constant 0 : i32
    return %c0_i32, %c0_i32_0 : i32, i32
  }
  func.func @transform_3(%arg0: i32) -> (i32, i32) {
    %c0_i32 = arith.constant 0 : i32
    %c0_i32_0 = arith.constant 0 : i32
    %c0_i32_1 = arith.constant 0 : i32
    return %c0_i32, %c0_i32_0 : i32, i32
  }
  func.func @transform_4(%arg0: i32) -> (i32, i32) {
    %c0_i32 = arith.constant 0 : i32
    %c0_i32_0 = arith.constant 0 : i32
    %c0_i32_1 = arith.constant 0 : i32
    return %c0_i32, %c0_i32_0 : i32, i32
  }
  func.func @transform_5(%arg0: i32) -> (i32, i32) {
    %c0_i32 = arith.constant 0 : i32
    %c0_i32_0 = arith.constant 0 : i32
    %c0_i32_1 = arith.constant 0 : i32
    return %c0_i32, %c0_i32_0 : i32, i32
  }
  func.func @transform_6(%arg0: i32) -> (i32, i32) {
    %c0_i32 = arith.constant 0 : i32
    %c0_i32_0 = arith.constant 0 : i32
    return %arg0, %c0_i32 : i32, i32
  }
  func.func @transform_7(%arg0: i32) -> (i32, i32) {
    %c0_i32 = arith.constant 0 : i32
    %c0_i32_0 = arith.constant 0 : i32
    return %arg0, %c0_i32 : i32, i32
  }
}

</mosaic_0001>

<bundles_post_ra>
// kernel: tpu_custom_call.1
= control target key start
LH: loop header
LB: loop body
LE: loop exit
PB: predicated region body
PF: predicated region fallthrough
CT: control target
= control target key end

     0   :  { %s1718_s0 = inlined_call_operand.hbm [shape: bf16[256,128], index: 0, kind: input, shape index: {}]   ;;  %s1719_s1 = inlined_call_operand.hbm [shape: bf16[128,128], index: 1, kind: input, shape index: {}]   ;;  %s1720_s2 = inlined_call_operand.vmem [shape: f32[1,128], index: 2, kind: input, shape index: {}]   ;;  %s1721_s3 = inlined_call_operand.hbm [shape: bf16[128,128], index: 3, kind: input, shape index: {}]   ;;  %s1722_s4 = inlined_call_operand.vmem [shape: f32[1,128], index: 4, kind: input, shape index: {}]   ;;  %s1723_s5 = inlined_call_operand.vmem [shape: f32[1,128], index: 5, kind: input, shape index: {}]   ;;  %s1724_s6 = inlined_call_operand.hbm [shape: f32[256,128], index: 6, kind: output, shape index: {0}]   ;;  %s1725_s7 = inlined_call_operand.vmem [shape: f32[256,1], index: 7, kind: output, shape index: {1}]  }
   0x1   :  { %1728 = sst [smem:[#allocation12_spill]] %s1719_s1 }
   0x2   :  { %13 = vsyncpa [#allocation3], 0 }
   0x3   :  { %15 = vsyncpa [#allocation3 + $0x1], 0 }
   0x4   :  { %16 = vsyncpa [#allocation6], 0 }
   0x5   :  { %17 = vsyncpa [#allocation4], 0 }
   0x6   :  { %19 = vsyncpa [#allocation4 + $0x1], 0  ;;  %s1417_s24 = smov 0   ;;  %s1419_s25 = smov 0  }
   0x7   :  { %s1421_s26 = smov 0   ;;  %s1423_s27 = smov 0  }
   0x8 LB: > { %s1438_s28 = sadd.s32 4294967295, %s1369_s27   ;;  %s945_s29 = sadd.s32 4294967294, %s1369_s27   ;;  %s1369_s27 = sphi %s1423_s27, %s1741_s27   ;;  %s1365_s26 = sphi %s1421_s26, %s1740_s26   ;;  %s1361_s25 = sphi %s1419_s25, %s1739_s25   ;;  %s1357_s24 = sphi %s1417_s24, %s1738_s24  }
   0x9   : > { %p45_p0 = scmp.ne.s32.totalorder %s1361_s25, %s1357_s24  ;;  %p46_p1 = scmp.eq.s32.totalorder %s1438_s28, 0 }
   0xa   : > { %p174_p2 = scmp.eq.s32.totalorder %s1438_s28, 1  ;;  %p180_p3 = scmp.eq.s32.totalorder %s945_s29, 1 }
   0xb   : > { %p1447_p4 = por %p46_p1, %p45_p0  ;;  %p946_p5 = scmp.ge.s32.totalorder %s1369_s27, 1 }
   0xc   : > { %p1452_p6 = por %p180_p3, %p45_p0  ;;  %p213_p7 = scmp.lt.s32.totalorder %s1369_s27, 3 }
   0xd   : > { %s1731_s1 = sld [smem:[#allocation12_spill]]  ;;  %s1371_s13 = smov [#allocation5]  }
   0xe   : > { %p1460_p8 = pnand %p946_p5, %p213_p7  ;;  %s226_s14 = sshll.u32 %s1371_s13, 4  ;;  %s227_s14 = int_to_ptr.vmem [resolvable:$true] %s226_s14 }
   0xf   : > { %s241_s17 = sshll.u32 %s1721_s3, 4  ;;  %s1726_s18 = smov 64   ;;  %s242_s17 = int_to_ptr.hbm [resolvable:$true] %s241_s17 }
  0x10   : > { %p1115_p9 = pneg %p1460_p8  ;;  %s1727_s19 = smov 4  }
  0x11   : > { %s1374_s20 = smov [#allocation7]   ;;  %s1479_s22 = sadd.s32 1, %s1369_s27  }
  0x12   : > { %p1116_p10 = pnand %p1115_p9, %p46_p1  ;;  %s243_s21 = sshll.u32 %s1374_s20, 4  ;;  %s244_s21 = int_to_ptr.vmem [resolvable:$true] %s243_s21 }
  0x13   : > { %s224_s11 = sshll.u32 %s1731_s1, 4  ;;  %s32_s23 = sadd.s32 1, %s1365_s26  ;;  %s225_s11 = int_to_ptr.hbm [resolvable:$true] %s224_s11 }
  0x14   : > { %1118 = dma.hbm_to_vmem [thread:$0]  (!%p1116_p10), %s225_s11, 1024, %s227_s14, [#allocation6], %s1726_s18, %s1726_s18, %s1727_s19  }
  0x15   : > { %1121 = dma.hbm_to_vmem [thread:$0]  (!%p1116_p10), %s242_s17, 1024, %s244_s21, [#allocation6], %s1726_s18, %s1726_s18, %s1727_s19  }
  0x16   : > { %s29_s29 = ssub.s32 %s1369_s27, %s1479_s22  ;;  %p39_p12 = scmp.ne.s32.totalorder %s1365_s26, %s1361_s25 }
  0x17   : > { %p30_p13 = scmp.eq.s32.totalorder %s29_s29, 0  ;;  %p40_p0 = scmp.eq.s32.totalorder %s1369_s27, 0 }
  0x18   : > { %p1489_p3 = por %p174_p2, %p39_p12  ;;  %p1132_p5 = scmp.lt.s32.totalorder %s1369_s27, 2 }
  0x19   : > { %s1495_s10 = scalar_select %p30_p13, %s1365_s26, %s32_s23  }
  0x1a   : > { %p41_p7 = por %p40_p0, %p39_p12  ;;  %s263_s11 = sand.u32 1, %s1365_s26  }
  0x1b   : > { %s950_s13 = sshll.u32 %s263_s11, 6  ;;  %s1061_s14 = sshll.u32 %s1369_s27, 6 }
  0x1c   : > { %s272_s17 = scalar_lea.hbm %s1718_s0, %s1061_s14  ;;  %s267_s20 = scalar_lea.vmem [#allocation2], %s950_s13 }
  0x1d   : > { %s275_s21 = sshll.u32 %s267_s20, 4  ;;  %s273_s29 = sshll.u32 %s272_s17, 4  ;;  %s276_s21 = int_to_ptr.vmem [resolvable:$true] %s275_s21  ;;  %s274_s29 = int_to_ptr.hbm [resolvable:$true] %s273_s29 }
  0x1e   : > { %p1502_p2 = pnand %p1132_p5, %p41_p7  ;;  %s264_s23 = scalar_lea.sflag [#allocation3], %s263_s11 }
  0x1f   : > { %s1269_s19 = sshra.s32 %s274_s29, 4  ;;  %s1276_s15 = scalar_lea.hbm %s1718_s0, 128  ;;  %s1270_s19 = int_to_ptr.hbm [resolvable:$true] %s1269_s19 }
  0x20   : > { %s1271_s1 = scalar_lea.hbm %s1270_s19, 64  ;;  %p1273_p10 = pneg %p1502_p2 }
  0x21   : > { %p1272_p9 = scmp.ne.s32.totalorder %s1270_s19, %s1271_s1  ;;  %p1277_p0 = scmp.lt.s32.totalorder %s1270_s19, %s1718_s0 }
  0x22   : > { %p1278_p5 = scmp.lt.s32.totalorder %s1276_s15, %s1271_s1 }
  0x23   : > { %p1274_p12 = pnand %p1273_p10, %p1272_p9 }
  0x24   : > { %p1279_p7 = por %p1278_p5, %p1277_p0 }
  0x25   : > { %p1275_p13 = pneg %p1274_p12 }
  0x27   : > { %p1280_p11 = pnand %p1279_p7, %p1275_p13 }
  0x29   : > { %1283 = shalt.err (!%p1280_p11)
}
  0x2a   : > { %s1735_s11 = smov 4   ;;  %s1736_s20 = smov 64  }
  0x2b   : > { %1125 = dma.hbm_to_vmem [thread:$0]  (!%p1502_p2), %s274_s29, 1024, %s276_s21, %s264_s23, %s1736_s20, %s1736_s20, %s1735_s11  }
  0x2c   : > { %287 = sbr.rel (%p1460_p8) target bundleno = 477 (0x1dd), region = 44  ;;  %s1522_s14 = sand.u32 (!%p1460_p8), 1, %s1361_s25  }
  0x2d   : > { %s954_s19 = sshll.u32 (!%p1460_p8), %s1522_s14, 6  ;;  %s290_s1 = scalar_lea.sflag (!%p1460_p8), [#allocation3], %s1522_s14 }
  0x2e   : > { %s1526_s13 = scalar_lea.vmem (!%p1460_p8), [#allocation2], %s954_s19 }
  0x31   : > { %1344 = dma.done.wait (%p1447_p4), %s290_s1, 1024  }
  0x32   : > { %1346 = vsyncadd (%p1447_p4), %s290_s1, 4294966272 }
  0x33   : > { %1348 = dma.done.wait (%p46_p1), [#allocation6], 2048  }
  0x34   : > { %1350 = vsyncadd (%p46_p1), [#allocation6], 4294965248  ;;  %v1077_v0 = vld [vmem:[#allocation5 + $0x38] sm:$0xff]  ;;  %v1076_v1 = vld [vmem:[#allocation5 + $0x30] sm:$0xff]  ;;  %s958_s29 = sshll.u32 %s1438_s28, 4  ;;  %vm786_vm0 = vcmask 7168  }
  0x35   : > { %496 = vmatpush.bf16.xpose.msra.mxu0 %v1077_v0  ;;  %1087 = vmatpush.bf16.xpose.msra.mxu2 %v1077_v0  ;;  %v1075_v2 = vld [vmem:[#allocation5 + $0x28] sm:$0xff]  ;;  %v1074_v3 = vld [vmem:[#allocation5 + $0x20] sm:$0xff]  ;;  %v1073_v4 = vld [vmem:[#allocation5 + $0x18] sm:$0xff]  ;;  %p343_p1 = scmp.lt.s32.totalorder %s958_s29, 31  ;;  %s957_s19 = sshll.u32 %s1522_s14, 7 }
  0x36   : > { %v1072_v5 = vld [vmem:[#allocation5 + $0x10] sm:$0xff]  ;;  %v1071_v6 = vld [vmem:[#allocation5 + $0x8] sm:$0xff]  ;;  %v1070_v7 = vld [vmem:[#allocation5] sm:$0xff]  ;;  %s1625_s1 = scalar_lea.vmem [#allocation8], %s957_s19  ;;  %s1319_s11 = scalar_lea.hbm %s1724_s6, 256 }
  0x37   : > { %v1062_v8 = vld [vmem:[%s1526_s13] sm:$0xff]  ;;  %v1065_v9 = vld [vmem:[%s1526_s13 + $0x18] sm:$0xff]  ;;  %v1063_v10 = vld [vmem:[%s1526_s13 + $0x8] sm:$0xff]  ;;  %s1743_s29 = smov (!%p343_p1, %s958_s29), 31  ;;  %s821_s21 = sshll.u32 %s1625_s1, 4  ;;  %s822_s21 = int_to_ptr.vmem [resolvable:$true] %s821_s21 }
  0x38   : > { %v1066_v11 = vld [vmem:[%s1526_s13 + $0x20] sm:$0xff]  ;;  %v1064_v12 = vld [vmem:[%s1526_s13 + $0x10] sm:$0xff]  ;;  %v1067_v13 = vld [vmem:[%s1526_s13 + $0x28] sm:$0xff]  ;;  %s959_s23 = sshll.u32 %s1743_s29, 3 }
  0x39   : > { %v1085_v14 = vld [vmem:[#allocation7 + $0x38] sm:$0xff]  ;;  %v1084_v15 = vld [vmem:[#allocation7 + $0x30] sm:$0xff]  ;;  %v1083_v16 = vld [vmem:[#allocation7 + $0x28] sm:$0xff]  ;;  %s1610_s17 = scalar_lea.vmem %s1725_s7, %s959_s23  ;;  %s804_s23 = scalar_lea.sflag [#allocation4], %s1522_s14 }
  0x3a   : > { %621 = vmatpush.bf16.msra.mxu1 %v1085_v14  ;;  %1095 = vmatpush.bf16.msra.mxu3 %v1085_v14  ;;  %v1068_v17 = vld [vmem:[%s1526_s13 + $0x30] sm:$0xff]  ;;  %v1069_v18 = vld [vmem:[%s1526_s13 + $0x38] sm:$0xff]  ;;  %v1082_v19 = vld [vmem:[#allocation7 + $0x20] sm:$0xff]  ;;  %s1086_s13 = sshll.u32 %s1438_s28, 7 }
  0x3b   : > { %v1081_v20 = vld [vmem:[#allocation7 + $0x18] sm:$0xff]  ;;  %v1080_v21 = vld [vmem:[#allocation7 + $0x10] sm:$0xff]  ;;  %v1079_v22 = vld [vmem:[#allocation7 + $0x8] sm:$0xff]  ;;  %s820_s18 = scalar_lea.hbm %s1724_s6, %s1086_s13 }
  0x3c   : > { %v1078_v23 = vld [vmem:[#allocation7] sm:$0xff]  ;;  %s823_s29 = sshll.u32 %s820_s18, 4  ;;  %s824_s29 = int_to_ptr.hbm [resolvable:$true] %s823_s29 }
  0x3d   : > { %497 = vmatpush.bf16.xpose.msra.mxu0 %v1076_v1  ;;  %1088 = vmatpush.bf16.xpose.msra.mxu2 %v1076_v1  ;;  %v1547_v24 = vld [vmem:[%s1720_s2] ss:$0 sm:$0xff]  ;;  %s1313_s28 = sshra.s32 %s824_s29, 4  ;;  %s1314_s28 = int_to_ptr.hbm [resolvable:$true] %s1313_s28 }
  0x3e   : > { %622 = vmatpush.bf16.msra.mxu1 %v1084_v15  ;;  %1096 = vmatpush.bf16.msra.mxu3 %v1084_v15  ;;  %v1555_v33 = vld [vmem:[%s1723_s5] ss:$0 sm:$0xff]  ;;  %s1315_s15 = scalar_lea.hbm %s1314_s28, 128  ;;  %p1320_p2 = scmp.lt.s32.totalorder %s1314_s28, %s1724_s6 }
  0x3f   : > { %p1316_p4 = scmp.ne.s32.totalorder %s1314_s28, %s1315_s15  ;;  %p1321_p9 = scmp.lt.s32.totalorder %s1319_s11, %s1315_s15 }
  0x41   : > { %p1317_p8 = pnand %p1316_p4, %p1489_p3  ;;  %p1322_p10 = por %p1321_p9, %p1320_p2 }
  0x42   : > { %623 = vmatpush.bf16.msra.mxu1 %v1083_v16  ;;  %1097 = vmatpush.bf16.msra.mxu3 %v1083_v16 }
  0x43   : > { %p1318_p11 = pneg %p1317_p8 }
  0x45   : > { %498 = vmatpush.bf16.xpose.msra.mxu0 %v1075_v2  ;;  %1089 = vmatpush.bf16.xpose.msra.mxu2 %v1075_v2  ;;  %p1323_p12 = pnand %p1322_p10, %p1318_p11 }
  0x46   : > { %624 = vmatpush.bf16.msra.mxu1 %v1082_v19  ;;  %1098 = vmatpush.bf16.msra.mxu3 %v1082_v19 }
  0x4a   : > { %625 = vmatpush.bf16.msra.mxu1 %v1081_v20  ;;  %1099 = vmatpush.bf16.msra.mxu3 %v1081_v20 }
  0x4d   : > { %499 = vmatpush.bf16.xpose.msra.mxu0 %v1074_v3  ;;  %1090 = vmatpush.bf16.xpose.msra.mxu2 %v1074_v3 }
  0x4e   : > { %626 = vmatpush.bf16.msra.mxu1 %v1080_v21  ;;  %1100 = vmatpush.bf16.msra.mxu3 %v1080_v21 }
  0x52   : > { %627 = vmatpush.bf16.msra.mxu1 %v1079_v22  ;;  %1101 = vmatpush.bf16.msra.mxu3 %v1079_v22 }
  0x55   : > { %500 = vmatpush.bf16.xpose.msra.mxu0 %v1073_v4  ;;  %1091 = vmatpush.bf16.xpose.msra.mxu2 %v1073_v4 }
  0x56   : > { %628 = vmatpush.bf16.msra.mxu1 %v1078_v23  ;;  %1102 = vmatpush.bf16.msra.mxu3 %v1078_v23 }
  0x5d   : > { %501 = vmatpush.bf16.xpose.msra.mxu0 %v1072_v5  ;;  %1092 = vmatpush.bf16.xpose.msra.mxu2 %v1072_v5 }
  0x65   : > { %502 = vmatpush.bf16.xpose.msra.mxu0 %v1071_v6  ;;  %1093 = vmatpush.bf16.xpose.msra.mxu2 %v1071_v6 }
  0x6d   : > { %503 = vmatpush.bf16.xpose.msra.mxu0 %v1070_v7  ;;  %1094 = vmatpush.bf16.xpose.msra.mxu2 %v1070_v7 }
  0x74   : > { %504 = vmatmul.bf16.vlgmr.msra.gmra.mxu0 %v1062_v8  ;;  %519 = vmatmul.bf16.vlgmr.msra.gmra.mxu2 %v1065_v9 }
  0x84   : > { %509 = vmatmul.bf16.gmra.mxu0 %v1063_v10  ;;  %524 = vmatmul.bf16.gmra.mxu2 %v1066_v11 }
  0x94   : > { %514 = vmatmul.bf16.gmra.mxu0 %v1064_v12  ;;  %529 = vmatmul.bf16.gmra.mxu2 %v1067_v13 }
  0xa4   : > { %534 = vmatmul.bf16.gmra.mxu2 %v1068_v17 }
  0xb4   : > { %539 = vmatmul.bf16.gmra.mxu2 %v1069_v18 }
  0xf1   : > { %v505_v25 = vpop.f32.mrf.mxu0 }
  0xf2   : > { %v506_v26 = vadd.f32 %v1547_v24, %v505_v25 }
  0xf4   : > { %1177 = vtanh.f32 %v506_v26 }
  0xf7   : > { %v520_v27 = vpop.f32.mrf.mxu2 }
  0xf8   : > { %v521_v28 = vadd.f32 %v1547_v24, %v520_v27 }
  0xf9   : > { %v507_v29 = vpop.f32.mrf.mxu0 }
  0xfa   : > { %v1178_v30 = vpop.eup %1177  ;;  %1179 = vtanh.f32 %v521_v28  ;;  %v508_v31 = vadd.f32 %v1547_v24, %v507_v29 }
  0xfb   : > { %v686_v32 = vmul.f32 %v1178_v30, %v1178_v30 }
  0xfc   : > { %1181 = vtanh.f32 %v508_v31 }
  0xfd   : > { %v702_v34 = vsub.f32 1.0, %v686_v32 }
  0xff   : > { %v522_v35 = vpop.f32.mrf.mxu2  ;;  %v722_v36 = vmul.f32 %v1555_v33, %v702_v34 }
 0x100   : > { %v1558_v37 = vpop.eup %1179  ;;  %v523_v38 = vadd.f32 %v1547_v24, %v522_v35 }
 0x101   : > { %v510_v39 = vpop.f32.mrf.mxu0  ;;  %738 = vadd.xlane.f32.xlu0 %v722_v36  ;;  %v692_v40 = vmul.f32 %v1558_v37, %v1558_v37 }
 0x102   : > { %v1182_v41 = vpop.eup %1181  ;;  %1183 = vtanh.f32 %v523_v38  ;;  %v511_v42 = vadd.f32 %v1547_v24, %v510_v39 }
 0x103   : > { %v561_v43 = vpack.c.bf16 %v1182_v41, %v1178_v30  ;;  %v708_v44 = vsub.f32 1.0, %v692_v40  ;;  %v687_v47 = vmul.f32 %v1182_v41, %v1182_v41 }
 0x104   : > { %1185 = vtanh.f32 %v511_v42 }
 0x105   : > { %629 = vmatmul.bf16.vlgmr.msra.gmra.mxu1 %v561_v43  ;;  %v728_v46 = vmul.f32 %v1555_v33, %v708_v44  ;;  %v703_v55 = vsub.f32 1.0, %v687_v47 }
 0x107   : > { %v525_v45 = vpop.f32.mrf.mxu2  ;;  %v723_v59 = vmul.f32 %v1555_v33, %v703_v55 }
 0x108   : > { %v1565_v48 = vpop.eup %1183  ;;  %v526_v49 = vadd.f32 %v1547_v24, %v525_v45 }
 0x109   : > { %v512_v50 = vpop.f32.mrf.mxu0  ;;  %750 = vadd.xlane.f32.xlu0 %v728_v46  ;;  %v693_v51 = vmul.f32 %v1565_v48, %v1565_v48  ;;  %v564_v47 = vpack.c.bf16 %v1565_v48, %v1558_v37 }
 0x10a   : > { %v1186_v52 = vpop.eup %1185  ;;  %1187 = vtanh.f32 %v526_v49  ;;  %v513_v53 = vadd.f32 %v1547_v24, %v512_v50 }
 0x10b   : > { %v709_v54 = vsub.f32 1.0, %v693_v51  ;;  %v688_v56 = vmul.f32 %v1186_v52, %v1186_v52 }
 0x10c   : > { %1189 = vtanh.f32 %v513_v53 }
 0x10d   : > { %v729_v57 = vmul.f32 %v1555_v33, %v709_v54  ;;  %v704_v60 = vsub.f32 1.0, %v688_v56 }
 0x10f   : > { %v527_v58 = vpop.f32.mrf.mxu2  ;;  %752 = vadd.xlane.f32.xlu1 %v729_v57  ;;  %v724_v5 = vmul.f32 %v1555_v33, %v704_v60 }
 0x110   : > { %v1573_v61 = vpop.eup %1187  ;;  %v528_v62 = vadd.f32 %v1547_v24, %v527_v58 }
 0x111   : > { %v515_v63 = vpop.f32.mrf.mxu0  ;;  %740 = vadd.xlane.f32.xlu0 %v723_v59  ;;  %v694_v0 = vmul.f32 %v1573_v61, %v1573_v61 }
 0x112   : > { %v1190_v1 = vpop.eup %1189  ;;  %1191 = vtanh.f32 %v528_v62  ;;  %v516_v2 = vadd.f32 %v1547_v24, %v515_v63 }
 0x113   : > { %v562_v3 = vpack.c.bf16 %v1190_v1, %v1186_v52  ;;  %v710_v4 = vsub.f32 1.0, %v694_v0  ;;  %v689_v7 = vmul.f32 %v1190_v1, %v1190_v1 }
 0x114   : > { %1193 = vtanh.f32 %v516_v2 }
 0x115   : > { %634 = vmatmul.bf16.gmra.mxu1 %v562_v3  ;;  %v730_v6 = vmul.f32 %v1555_v33, %v710_v4  ;;  %v705_v12 = vsub.f32 1.0, %v689_v7 }
 0x117   : > { %v530_v8 = vpop.f32.mrf.mxu2  ;;  %754 = vadd.xlane.f32.xlu2 %v730_v6  ;;  %742 = vadd.xlane.f32.xlu1 %v724_v5  ;;  %v725_v18 = vmul.f32 %v1555_v33, %v705_v12  ;;  %v1619_v6 = vld [vmem:[%s1722_s4] ss:$0 sm:$0xff] }
 0x118   : > { %v1581_v9 = vpop.eup %1191  ;;  %v531_v10 = vadd.f32 %v1547_v24, %v530_v8 }
 0x119   : > { %v517_v11 = vpop.f32.mrf.mxu0  ;;  %v695_v13 = vmul.f32 %v1581_v9, %v1581_v9  ;;  %v565_v60 = vpack.c.bf16 %v1581_v9, %v1573_v61 }
 0x11a   : > { %v1194_v14 = vpop.eup %1193  ;;  %1195 = vtanh.f32 %v531_v10  ;;  %v518_v15 = vadd.f32 %v1547_v24, %v517_v11 }
 0x11b   : > { %v711_v16 = vsub.f32 1.0, %v695_v13  ;;  %v690_v17 = vmul.f32 %v1194_v14, %v1194_v14 }
 0x11c   : > { %1197 = vtanh.f32 %v518_v15 }
 0x11d   : > { %v731_v19 = vmul.f32 %v1555_v33, %v711_v16  ;;  %v706_v20 = vsub.f32 1.0, %v690_v17 }
 0x11f   : > { %v532_v21 = vpop.f32.mrf.mxu2  ;;  %744 = vadd.xlane.f32.xlu1 %v725_v18  ;;  %756 = vadd.xlane.f32.xlu0 %v731_v19  ;;  %v726_v22 = vmul.f32 %v1555_v33, %v706_v20 }
 0x120   : > { %v1196_v23 = vpop.eup %1195  ;;  %v533_v25 = vadd.f32 %v1547_v24, %v532_v21 }
 0x121   : > { %746 = vadd.xlane.f32.xlu2 %v726_v22  ;;  %v696_v26 = vmul.f32 %v1196_v23, %v1196_v23 }
 0x122   : > { %v1198_v27 = vpop.eup %1197  ;;  %1199 = vtanh.f32 %v533_v25 }
 0x123   : > { %v563_v28 = vpack.c.bf16 %v1198_v27, %v1194_v14  ;;  %v712_v29 = vsub.f32 1.0, %v696_v26  ;;  %v691_v30 = vmul.f32 %v1198_v27, %v1198_v27 }
 0x125   : > { %639 = vmatmul.bf16.gmra.mxu1 %v563_v28  ;;  %v732_v31 = vmul.f32 %v1555_v33, %v712_v29  ;;  %v707_v32 = vsub.f32 1.0, %v691_v30 }
 0x127   : > { %v535_v34 = vpop.f32.mrf.mxu2  ;;  %758 = vadd.xlane.f32.xlu1 %v732_v31  ;;  %v727_v35 = vmul.f32 %v1555_v33, %v707_v32 }
 0x128   : > { %v1200_v36 = vpop.eup %1199  ;;  %v536_v38 = vadd.f32 %v1547_v24, %v535_v34 }
 0x129   : > { %748 = vadd.xlane.f32.xlu2 %v727_v35  ;;  %v566_v39 = vpack.c.bf16 %v1200_v36, %v1196_v23  ;;  %v697_v40 = vmul.f32 %v1200_v36, %v1200_v36 }
 0x12a   : > { %1201 = vtanh.f32 %v536_v38 }
 0x12b   : > { %654 = vmatmul.bf16.vlgmr.msra.gmra.mxu3 %v566_v39  ;;  %v713_v41 = vsub.f32 1.0, %v697_v40 }
 0x12d   : > { %v733_v43 = vmul.f32 %v1555_v33, %v713_v41 }
 0x12f   : > { %v537_v42 = vpop.f32.mrf.mxu2 }
 0x130   : > { %v1202_v44 = vpop.eup %1201  ;;  %v538_v45 = vadd.f32 %v1547_v24, %v537_v42 }
 0x131   : > { %760 = vadd.xlane.f32.xlu2 %v733_v43  ;;  %v698_v46 = vmul.f32 %v1202_v44, %v1202_v44 }
 0x132   : > { %1203 = vtanh.f32 %v538_v45 }
 0x133   : > { %v714_v49 = vsub.f32 1.0, %v698_v46 }
 0x135   : > { %644 = vmatmul.bf16.gmra.mxu1 %v564_v47  ;;  %v734_v50 = vmul.f32 %v1555_v33, %v714_v49 }
 0x137   : > { %v540_v51 = vpop.f32.mrf.mxu2  ;;  %762 = vadd.xlane.f32.xlu0 %v734_v50 }
 0x138   : > { %v1204_v52 = vpop.eup %1203  ;;  %v541_v53 = vadd.f32 %v1547_v24, %v540_v51 }
 0x139   : > { %v567_v54 = vpack.c.bf16 %v1204_v52, %v1202_v44  ;;  %v699_v55 = vmul.f32 %v1204_v52, %v1204_v52 }
 0x13a   : > { %1205 = vtanh.f32 %v541_v53 }
 0x13b   : > { %659 = vmatmul.bf16.gmra.mxu3 %v567_v54  ;;  %v715_v56 = vsub.f32 1.0, %v699_v55 }
 0x13d   : > { %v735_v57 = vmul.f32 %v1555_v33, %v715_v56 }
 0x13f   : > { %v542_v58 = vpop.f32.mrf.mxu2  ;;  %764 = vadd.xlane.f32.xlu1 %v735_v57 }
 0x140   : > { %v1206_v59 = vpop.eup %1205  ;;  %v543_v37 = vadd.f32 %v1547_v24, %v542_v58 }
 0x141   : > { %v700_v48 = vmul.f32 %v1206_v59, %v1206_v59 }
 0x142   : > { %1207 = vtanh.f32 %v543_v37 }
 0x143   : > { %v716_v62 = vsub.f32 1.0, %v700_v48 }
 0x145   : > { %649 = vmatmul.bf16.gmra.mxu1 %v565_v60  ;;  %v736_v63 = vmul.f32 %v1555_v33, %v716_v62 }
 0x147   : > { %766 = vadd.xlane.f32.xlu2 %v736_v63 }
 0x148   : > { %v1208_v0 = vpop.eup %1207 }
 0x149   : > { %v568_v1 = vpack.c.bf16 %v1208_v0, %v1206_v59  ;;  %v701_v2 = vmul.f32 %v1208_v0, %v1208_v0 }
 0x14b   : > { %664 = vmatmul.bf16.gmra.mxu3 %v568_v1  ;;  %v717_v3 = vsub.f32 1.0, %v701_v2 }
 0x14d   : > { %v737_v4 = vmul.f32 %v1555_v33, %v717_v3 }
 0x14f   : > { %768 = vadd.xlane.f32.xlu0 %v737_v4 }
 0x174   : > { %v739_v24 = vpop.xlane.xlu0 %738 }
 0x175   : > { %v770_v61 = vsub.f32 0.0, %v739_v24 }
 0x177   : > { %787 = vst.msk [vmem:[%s1610_s17] sm:$0xff] %vm786_vm0, %v770_v61 }
 0x17c   : > { %v751_v33 = vpop.xlane.xlu0 %750 }
 0x17d   : > { %v776_v5 = vsub.f32 0.0, %v751_v33 }
 0x17f   : > { %793 = vst.msk [vmem:[%s1610_s17 + $0x30] sm:$0xff] %vm786_vm0, %v776_v5 }
 0x182   : > { %v753_v7 = vpop.xlane.xlu1 %752  ;;  %v630_v8 = vpop.f32.mrf.mxu1 }
 0x183   : > { %v777_v9 = vsub.f32 0.0, %v753_v7  ;;  %v631_v10 = vadd.f32 %v1619_v6, %v630_v8 }
 0x184   : > { %v741_v11 = vpop.xlane.xlu0 %740 }
 0x185   : > { %794 = vst.msk [vmem:[%s1610_s17 + $0x38] sm:$0xff] %vm786_vm0, %v777_v9  ;;  %v771_v12 = vsub.f32 0.0, %v741_v11 }
 0x186   : > { %670 = vst [vmem:[%s1625_s1] sm:$0xff] %v631_v10 }
 0x187   : > { %788 = vst.msk [vmem:[%s1610_s17 + $0x8] sm:$0xff] %vm786_vm0, %v771_v12 }
 0x18a   : > { %v755_v13 = vpop.xlane.xlu2 %754  ;;  %v743_v14 = vpop.xlane.xlu1 %742 }
 0x18b   : > { %v778_v15 = vsub.f32 0.0, %v755_v13  ;;  %v772_v16 = vsub.f32 0.0, %v743_v14  ;;  %v632_v17 = vpop.f32.mrf.mxu1 }
 0x18c   : > { %v633_v18 = vadd.f32 %v1619_v6, %v632_v17 }
 0x18d   : > { %795 = vst.msk [vmem:[%s1610_s17 + $0x40] sm:$0xff] %vm786_vm0, %v778_v15 }
 0x18e   : > { %789 = vst.msk [vmem:[%s1610_s17 + $0x10] sm:$0xff] %vm786_vm0, %v772_v16 }
 0x18f   : > { %671 = vst [vmem:[%s1625_s1 + $0x8] sm:$0xff] %v633_v18 }
 0x192   : > { %v745_v19 = vpop.xlane.xlu1 %744  ;;  %v757_v20 = vpop.xlane.xlu0 %756 }
 0x193   : > { %v773_v21 = vsub.f32 0.0, %v745_v19  ;;  %v779_v22 = vsub.f32 0.0, %v757_v20  ;;  %v635_v23 = vpop.f32.mrf.mxu1 }
 0x194   : > { %v636_v25 = vadd.f32 %v1619_v6, %v635_v23  ;;  %v747_v26 = vpop.xlane.xlu2 %746 }
 0x195   : > { %790 = vst.msk [vmem:[%s1610_s17 + $0x18] sm:$0xff] %vm786_vm0, %v773_v21  ;;  %v774_v27 = vsub.f32 0.0, %v747_v26 }
 0x196   : > { %796 = vst.msk [vmem:[%s1610_s17 + $0x48] sm:$0xff] %vm786_vm0, %v779_v22 }
 0x197   : > { %672 = vst [vmem:[%s1625_s1 + $0x10] sm:$0xff] %v636_v25 }
 0x198   : > { %791 = vst.msk [vmem:[%s1610_s17 + $0x20] sm:$0xff] %vm786_vm0, %v774_v27 }
 0x19a   : > { %v759_v28 = vpop.xlane.xlu1 %758 }
 0x19b   : > { %v780_v29 = vsub.f32 0.0, %v759_v28  ;;  %v637_v30 = vpop.f32.mrf.mxu1 }
 0x19c   : > { %v638_v31 = vadd.f32 %v1619_v6, %v637_v30  ;;  %v749_v32 = vpop.xlane.xlu2 %748 }
 0x19d   : > { %797 = vst.msk [vmem:[%s1610_s17 + $0x50] sm:$0xff] %vm786_vm0, %v780_v29  ;;  %v775_v34 = vsub.f32 0.0, %v749_v32 }
 0x19e   : > { %673 = vst [vmem:[%s1625_s1 + $0x18] sm:$0xff] %v638_v31 }
 0x19f   : > { %792 = vst.msk [vmem:[%s1610_s17 + $0x28] sm:$0xff] %vm786_vm0, %v775_v34 }
 0x1a3   : > { %v640_v35 = vpop.f32.mrf.mxu1 }
 0x1a4   : > { %v641_v36 = vadd.f32 %v1619_v6, %v640_v35  ;;  %v761_v38 = vpop.xlane.xlu2 %760 }
 0x1a5   : > { %v781_v39 = vsub.f32 0.0, %v761_v38 }
 0x1a6   : > { %674 = vst [vmem:[%s1625_s1 + $0x20] sm:$0xff] %v641_v36 }
 0x1a7   : > { %798 = vst.msk [vmem:[%s1610_s17 + $0x58] sm:$0xff] %vm786_vm0, %v781_v39 }
 0x1aa   : > { %v763_v40 = vpop.xlane.xlu0 %762 }
 0x1ab   : > { %v782_v41 = vsub.f32 0.0, %v763_v40  ;;  %v642_v42 = vpop.f32.mrf.mxu1 }
 0x1ac   : > { %v643_v43 = vadd.f32 %v1619_v6, %v642_v42 }
 0x1ad   : > { %799 = vst.msk [vmem:[%s1610_s17 + $0x60] sm:$0xff] %vm786_vm0, %v782_v41 }
 0x1ae   : > { %675 = vst [vmem:[%s1625_s1 + $0x28] sm:$0xff] %v643_v43  ;;  %v655_v44 = vpop.f32.mrf.mxu3 }
 0x1af   : > { %v656_v45 = vadd.f32 %v1619_v6, %v655_v44 }
 0x1b1   : > { %680 = vst [vmem:[%s1625_s1 + $0x50] sm:$0xff] %v656_v45 }
 0x1b2   : > { %v765_v46 = vpop.xlane.xlu1 %764 }
 0x1b3   : > { %v783_v47 = vsub.f32 0.0, %v765_v46  ;;  %v645_v49 = vpop.f32.mrf.mxu1 }
 0x1b4   : > { %v646_v50 = vadd.f32 %v1619_v6, %v645_v49 }
 0x1b5   : > { %800 = vst.msk [vmem:[%s1610_s17 + $0x68] sm:$0xff] %vm786_vm0, %v783_v47 }
 0x1b6   : > { %676 = vst [vmem:[%s1625_s1 + $0x30] sm:$0xff] %v646_v50  ;;  %v657_v51 = vpop.f32.mrf.mxu3 }
 0x1b7   : > { %v658_v52 = vadd.f32 %v1619_v6, %v657_v51 }
 0x1b9   : > { %681 = vst [vmem:[%s1625_s1 + $0x58] sm:$0xff] %v658_v52 }
 0x1ba   : > { %v767_v53 = vpop.xlane.xlu2 %766 }
 0x1bb   : > { %v784_v54 = vsub.f32 0.0, %v767_v53  ;;  %v647_v55 = vpop.f32.mrf.mxu1 }
 0x1bc   : > { %v648_v56 = vadd.f32 %v1619_v6, %v647_v55 }
 0x1bd   : > { %801 = vst.msk [vmem:[%s1610_s17 + $0x70] sm:$0xff] %vm786_vm0, %v784_v54 }
 0x1be   : > { %677 = vst [vmem:[%s1625_s1 + $0x38] sm:$0xff] %v648_v56  ;;  %v660_v57 = vpop.f32.mrf.mxu3 }
 0x1bf   : > { %v661_v58 = vadd.f32 %v1619_v6, %v660_v57 }
 0x1c1   : > { %682 = vst [vmem:[%s1625_s1 + $0x60] sm:$0xff] %v661_v58 }
 0x1c2   : > { %v769_v59 = vpop.xlane.xlu0 %768 }
 0x1c3   : > { %v785_v37 = vsub.f32 0.0, %v769_v59  ;;  %v650_v48 = vpop.f32.mrf.mxu1 }
 0x1c4   : > { %v651_v60 = vadd.f32 %v1619_v6, %v650_v48 }
 0x1c5   : > { %802 = vst.msk [vmem:[%s1610_s17 + $0x78] sm:$0xff] %vm786_vm0, %v785_v37 }
 0x1c6   : > { %678 = vst [vmem:[%s1625_s1 + $0x40] sm:$0xff] %v651_v60  ;;  %v662_v62 = vpop.f32.mrf.mxu3 }
 0x1c7   : > { %v663_v63 = vadd.f32 %v1619_v6, %v662_v62 }
 0x1c9   : > { %683 = vst [vmem:[%s1625_s1 + $0x68] sm:$0xff] %v663_v63 }
 0x1cb   : > { %v652_v0 = vpop.f32.mrf.mxu1 }
 0x1cc   : > { %v653_v1 = vadd.f32 %v1619_v6, %v652_v0 }
 0x1ce   : > { %679 = vst [vmem:[%s1625_s1 + $0x48] sm:$0xff] %v653_v1  ;;  %v665_v2 = vpop.f32.mrf.mxu3 }
 0x1cf   : > { %v666_v3 = vadd.f32 %v1619_v6, %v665_v2 }
 0x1d1   : > { %684 = vst [vmem:[%s1625_s1 + $0x70] sm:$0xff] %v666_v3 }
 0x1d6   : > { %v667_v4 = vpop.f32.mrf.mxu3 }
 0x1d7   : > { %v668_v24 = vadd.f32 %v1619_v6, %v667_v4 }
 0x1d9   : > { %685 = vst [vmem:[%s1625_s1 + $0x78] sm:$0xff] %v668_v24 }
 0x1da   : > { %1326 = shalt.err (!%p1323_p12)
}
 0x1db   : > { %s1375_s14 = smov 128   ;;  %s1376_s1 = smov 8  }
 0x1dc   : > { %1113 = dma.vmem_to_hbm [thread:$0]  (%p1489_p3), %s822_s21, 2048, %s824_s29, %s804_s23, %s1375_s14, %s1375_s14, %s1376_s1  }
 0x1dd PF: > { %s842_s13 = sand.u32 1, %s1357_s24   ;;  %p1737_p13 = scmp.ge.s32.totalorder %s1369_s27, 2 }
 0x1de   : > { %s843_s30 = scalar_lea.sflag [#allocation4], %s842_s13 }
 0x1df   : > { %p1127_p0 = pnand %p1737_p13, %p1452_p6 }
 0x1e1   : > { %p1128_p5 = pneg %p1127_p0 }
 0x1e3   : > { %1352 = dma.done.wait (%p1128_p5), %s843_s30, 2048  }
 0x1e4   : > { %1354 = vsyncadd (%p1128_p5), %s843_s30, 4294965248  ;;  %p22_p7 = scmp.ge.s32.totalorder %s1479_s22, 4   ;;  %s1738_s24 = smov %s1361_s25 }
 0x1e5   : > { %s1739_s25 = smov %s1365_s26  ;;  %s1740_s26 = smov %s1495_s10 }
 0x1e6   : > { %s1741_s27 = smov %s1479_s22  ;;  %24 = sbr.rel (!%p22_p7) target bundleno = 8 (0x8), region = 109 }
 0x1eb   :  { %857 = vsyncpa [#allocation3], 1 }
 0x1ec   :  { %859 = vsyncpa [#allocation3 + $0x1], 1 }
 0x1ed   :  { %860 = vsyncpa [#allocation6], 1 }
 0x1ee   :  { %861 = vsyncpa [#allocation4], 1 }
 0x1ef   :  { %863 = vsyncpa [#allocation4 + $0x1], 1 }

</bundles_post_ra>
